<compile_context>
chip_gen: v6e
topology: v6e:2x2x1
jax: 0.10.0
libtpu: 0.0.40
codegen_flags: <defaults>
</compile_context>

<pallas_src>
import functools

import jax
import jax.numpy as jnp
from jax.experimental import pallas as pl
from jax.experimental.pallas import tpu as pltpu


def _round_up(n, m):
    return ((n + m - 1) // m) * m


def _classifier_generator_kernel(x_ref, w1_ref, b1_ref, wh_ref, bh_ref,
                                 out_ref, *, o_pad):
    # shared_net: Linear + ReLU (bf16/f32 operands, f32 accumulation on MXU).
    x = x_ref[...].astype(w1_ref.dtype)          # in-kernel cast: no extra HBM traffic
    z = jnp.dot(x, w1_ref[...], preferred_element_type=jnp.float32) + b1_ref[...]
    z = jnp.maximum(z, 0.0)

    # Fused heads: one matmul producing [mu | sigma_pre] of shape (tm, 2*Op).
    h = (jnp.dot(z.astype(wh_ref.dtype), wh_ref[...],
                 preferred_element_type=jnp.float32) + bh_ref[...])

    # Static, 128-aligned split (Op is a multiple of 128) -> free slices,
    # softplus (exp/log1p on the EUP) only touches the sigma half.
    mu = h[:, :o_pad]
    s = h[:, o_pad:]
    # softplus(beta=1, threshold=20): log1p(exp(s)) for s <= 20, identity above.
    sp = jnp.where(s > 20.0, s, jnp.log1p(jnp.exp(jnp.minimum(s, 20.0))))

    out_ref[:, :o_pad] = mu.astype(out_ref.dtype)
    out_ref[:, o_pad:] = sp.astype(out_ref.dtype)


def prepare_params(raw, *, use_bf16=True):
    """One-time parameter prep (hoisted out of the per-call forward).

    Fuses the two heads, zero-pads H and O to multiples of 128 (lane-dense
    matmuls + unmasked output stores) and casts matmul operands to bf16.
    Zero padding is exact: padded z columns are ReLU(0)=0 and padded head
    rows are 0, so padded dims contribute nothing to the real outputs.
    """
    w1, b1 = raw["w1"], raw["b1"]          # (In, H), (1, H)
    wmu, bmu = raw["wmu"], raw["bmu"]      # (H, O),  (1, O)
    wsg, bsg = raw["wsg"], raw["bsg"]      # (H, O),  (1, O)

    In, H = w1.shape
    O = wmu.shape[1]
    Hp = _round_up(H, 128)
    Op = _round_up(O, 128)

    def pad2(a, rows, cols):
        return jnp.pad(a, ((0, rows - a.shape[0]), (0, cols - a.shape[1])))

    w1p = pad2(w1, In, Hp)
    b1p = pad2(b1, 1, Hp)
    w_heads = jnp.concatenate([pad2(wmu, Hp, Op), pad2(wsg, Hp, Op)], axis=1)  # (Hp, 2*Op)
    b_heads = jnp.concatenate([pad2(bmu, 1, Op), pad2(bsg, 1, Op)], axis=1)    # (1, 2*Op)

    mm_dtype = jnp.bfloat16 if use_bf16 else jnp.float32
    return {
        "w1": w1p.astype(mm_dtype),
        "b1": b1p.astype(jnp.float32),          # biases stay f32 (added post-acc)
        "w_heads": w_heads.astype(mm_dtype),
        "b_heads": b_heads.astype(jnp.float32),
        "dims": (In, H, Hp, O, Op),
    }


def classifier_generator_forward(x, prep, *, block_m=512):
    """x: (B, In) float32. prep: output of prepare_params.

    Returns (mu, sigma), each (B, O) float32.
    """
    w1, b1 = prep["w1"], prep["b1"]
    wh, bh = prep["w_heads"], prep["b_heads"]
    In, H, Hp, O, Op = prep["dims"]

    B = x.shape[0]
    assert x.shape[1] == In

    # Batch tile: sublane-aligned, and small enough that real batches give
    # >= 2 grid steps (so the "parallel" axis can use both v7x TensorCores /
    # v5e-v6e megacore). No host-side pad of x: cdiv grid + Pallas boundary
    # handling covers the partial last block (garbage rows stay row-local).
    tm = min(block_m, B)
    if tm < B:
        tm = max(8, (tm // 8) * 8)
    if B > 8 and pl.cdiv(B, tm) < 2:
        tm = max(8, _round_up(pl.cdiv(B, 2), 8))
    grid_m = pl.cdiv(B, tm)

    kernel = functools.partial(_classifier_generator_kernel, o_pad=Op)

    itemsize = jnp.dtype(wh.dtype).itemsize
    cost = pl.CostEstimate(
        flops=2 * B * (In * Hp + Hp * 2 * Op),
        transcendentals=2 * B * Op,                       # exp + log1p on sigma half
        bytes_accessed=(B * In * 4                        # x
                        + (In * Hp + Hp * 2 * Op) * itemsize   # weights
                        + (Hp + 2 * Op) * 4               # biases
                        + B * 2 * Op * 4),                # output slab
    )

    # Pinned weights/bias: constant index_map -> never re-fetched, so a single
    # VMEM buffer suffices (pl.Buffered(1)); x and the output stream over the
    # batch with default double-buffering.
    pinned = pl.Buffered(1)
    out = pl.pallas_call(
        kernel,
        out_shape=jax.ShapeDtypeStruct((B, 2 * Op), jnp.float32),
        grid=(grid_m,),
        in_specs=[
            pl.BlockSpec((tm, In), lambda i: (i, 0)),                        # x (streamed)
            pl.BlockSpec((In, Hp), lambda i: (0, 0), pipeline_mode=pinned),  # W1
            pl.BlockSpec((1, Hp), lambda i: (0, 0), pipeline_mode=pinned),   # b1
            pl.BlockSpec((Hp, 2 * Op), lambda i: (0, 0), pipeline_mode=pinned),  # fused heads W
            pl.BlockSpec((1, 2 * Op), lambda i: (0, 0), pipeline_mode=pinned),   # fused heads b
        ],
        out_specs=pl.BlockSpec((tm, 2 * Op), lambda i: (i, 0)),
        compiler_params=pltpu.CompilerParams(
            dimension_semantics=("parallel",)),
        cost_estimate=cost,
    )(x, w1, b1, wh, bh)

    mu = out[:, :O]
    sigma = out[:, Op:Op + O]
    return mu, sigma


def init_params(key, input_size, hidden_size, output_size):
    """Deterministic synthetic init (uniform like nn.Linear default)."""
    ks = jax.random.split(key, 6)

    def lin(kw, kb, fan_in, fan_out):
        bound = 1.0 / jnp.sqrt(fan_in)
        w = jax.random.uniform(kw, (fan_in, fan_out), jnp.float32, -bound, bound)
        b = jax.random.uniform(kb, (1, fan_out), jnp.float32, -bound, bound)
        return w, b

    w1, b1 = lin(ks[0], ks[1], input_size, hidden_size)
    wmu, bmu = lin(ks[2], ks[3], hidden_size, output_size)
    wsg, bsg = lin(ks[4], ks[5], hidden_size, output_size)
    return {"w1": w1, "b1": b1, "wmu": wmu, "bmu": bmu, "wsg": wsg, "bsg": bsg}


def reference_forward(x, p):
    z = jnp.maximum(x @ p["w1"] + p["b1"], 0.0)
    mu = z @ p["wmu"] + p["bmu"]
    s = z @ p["wsg"] + p["bsg"]
    sigma = jnp.where(s > 20.0, s, jnp.log1p(jnp.exp(jnp.minimum(s, 20.0))))
    return mu, sigma


if __name__ == "__main__":
    input_size, hidden_size, output_size = 32, 64, 16
    batch = 8

    key = jax.random.PRNGKey(0)
    k_x, k_p, k_x2 = jax.random.split(key, 3)
    x = jax.random.normal(k_x, (batch, input_size), jnp.float32)
    params = init_params(k_p, input_size, hidden_size, output_size)

    mu_ref, sigma_ref = reference_forward(x, params)

    # Exact f32 path: must match the PyTorch-style reference tightly.
    prep_f32 = prepare_params(params, use_bf16=False)
    mu, sigma = classifier_generator_forward(x, prep_f32)
    jax.block_until_ready((mu, sigma))
    assert mu.shape == (batch, output_size) and sigma.shape == (batch, output_size)
    assert jnp.allclose(mu, mu_ref, atol=1e-5, rtol=1e-5)
    assert jnp.allclose(sigma, sigma_ref, atol=1e-5, rtol=1e-5)

    # Default bf16-operand path (MXU-native on v5e/v6e/v7x), f32 accumulation.
    prep_bf16 = prepare_params(params)  # use_bf16=True by default
    mu_bf, sigma_bf = classifier_generator_forward(x, prep_bf16)
    jax.block_until_ready((mu_bf, sigma_bf))
    assert jnp.allclose(mu_bf, mu_ref, atol=5e-2, rtol=5e-2)
    assert jnp.allclose(sigma_bf, sigma_ref, atol=5e-2, rtol=5e-2)

    # Exercise the multi-step grid + partial boundary block path (B=24 -> 2 tiles).
    x2 = jax.random.normal(k_x2, (24, input_size), jnp.float32)
    mu2_ref, sigma2_ref = reference_forward(x2, params)
    mu2, sigma2 = classifier_generator_forward(x2, prep_f32)
    jax.block_until_ready((mu2, sigma2))
    assert jnp.allclose(mu2, mu2_ref, atol=1e-5, rtol=1e-5)
    assert jnp.allclose(sigma2, sigma2_ref, atol=1e-5, rtol=1e-5)

    print("KERNEL_OK")
</pallas_src>

<mosaic_0001>
module attributes {stable_mosaic.version = 11 : i64} {
  func.func @_classifier_generator_kernel(%arg0: i32, %arg1: memref<8x32xf32, #tpu.memory_space<vmem>>, %arg2: memref<32x128xf32, #tpu.memory_space<vmem>>, %arg3: memref<1x128xf32, #tpu.memory_space<vmem>>, %arg4: memref<128x256xf32, #tpu.memory_space<vmem>>, %arg5: memref<1x256xf32, #tpu.memory_space<vmem>>, %arg6: memref<8x256xf32, #tpu.memory_space<vmem>>) attributes {dimension_semantics = [#tpu.dimension_semantics<parallel>], iteration_bounds = array<i64: 1>, scalar_prefetch = 0 : i64, scratch_operands = 0 : i64, tpu.core_type = #tpu.core_type<tc>, window_params = [{transform_indices = @transform_0, window_bounds = array<i64: 8, 32>}, {pipeline_mode = #tpu.pipeline_mode<synchronous>, transform_indices = @transform_1, window_bounds = array<i64: 32, 128>}, {pipeline_mode = #tpu.pipeline_mode<synchronous>, transform_indices = @transform_2, window_bounds = array<i64: 1, 128>}, {pipeline_mode = #tpu.pipeline_mode<synchronous>, transform_indices = @transform_3, window_bounds = array<i64: 128, 256>}, {pipeline_mode = #tpu.pipeline_mode<synchronous>, transform_indices = @transform_4, window_bounds = array<i64: 1, 256>}, {transform_indices = @transform_5, window_bounds = array<i64: 8, 256>}]} {
    %c0 = arith.constant 0 : index
    %c0_0 = arith.constant 0 : index
    %0 = vector.load %arg1[%c0, %c0_0] : memref<8x32xf32, #tpu.memory_space<vmem>>, vector<8x32xf32>
    %c0_1 = arith.constant 0 : index
    %c0_2 = arith.constant 0 : index
    %1 = vector.load %arg2[%c0_1, %c0_2] : memref<32x128xf32, #tpu.memory_space<vmem>>, vector<32x128xf32>
    %cst = arith.constant dense<0.000000e+00> : vector<8x128xf32>
    %2 = tpu.matmul %0, %1, %cst {dimension_numbers = #tpu.dot_dimension_numbers<[1], [0], [0], [1], [0, 0, 1, 1], [], []>} : vector<8x32xf32>, vector<32x128xf32>, vector<8x128xf32> -> vector<8x128xf32>
    %c0_3 = arith.constant 0 : index
    %c0_4 = arith.constant 0 : index
    %3 = vector.load %arg3[%c0_3, %c0_4] : memref<1x128xf32, #tpu.memory_space<vmem>>, vector<1x128xf32>
    %4 = vector.broadcast %3 : vector<1x128xf32> to vector<8x128xf32>
    %5 = arith.addf %2, %4 : vector<8x128xf32>
    %cst_5 = arith.constant 0.000000e+00 : f32
    %6 = vector.broadcast %cst_5 : f32 to vector<8x128xf32>
    %7 = arith.maximumf %5, %6 : vector<8x128xf32>
    %c0_6 = arith.constant 0 : index
    %c0_7 = arith.constant 0 : index
    %8 = vector.load %arg4[%c0_6, %c0_7] : memref<128x256xf32, #tpu.memory_space<vmem>>, vector<128x256xf32>
    %cst_8 = arith.constant dense<0.000000e+00> : vector<8x256xf32>
    %9 = tpu.matmul %7, %8, %cst_8 {dimension_numbers = #tpu.dot_dimension_numbers<[1], [0], [0], [1], [0, 0, 1, 1], [], []>} : vector<8x128xf32>, vector<128x256xf32>, vector<8x256xf32> -> vector<8x256xf32>
    %c0_9 = arith.constant 0 : index
    %c0_10 = arith.constant 0 : index
    %10 = vector.load %arg5[%c0_9, %c0_10] : memref<1x256xf32, #tpu.memory_space<vmem>>, vector<1x256xf32>
    %11 = vector.broadcast %10 : vector<1x256xf32> to vector<8x256xf32>
    %12 = arith.addf %9, %11 : vector<8x256xf32>
    %13 = vector.extract_strided_slice %12 {offsets = [0, 0], sizes = [8, 128], strides = [1, 1]} : vector<8x256xf32> to vector<8x128xf32>
    %14 = vector.extract_strided_slice %12 {offsets = [0, 128], sizes = [8, 128], strides = [1, 1]} : vector<8x256xf32> to vector<8x128xf32>
    %cst_11 = arith.constant 2.000000e+01 : f32
    %15 = vector.broadcast %cst_11 : f32 to vector<8x128xf32>
    %16 = arith.cmpf ogt, %14, %15 : vector<8x128xf32>
    %cst_12 = arith.constant 2.000000e+01 : f32
    %17 = vector.broadcast %cst_12 : f32 to vector<8x128xf32>
    %18 = arith.minimumf %14, %17 : vector<8x128xf32>
    %19 = math.exp %18 : vector<8x128xf32>
    %20 = math.log1p %19 : vector<8x128xf32>
    %21 = arith.select %16, %14, %20 : vector<8x128xi1>, vector<8x128xf32>
    %c0_13 = arith.constant 0 : index
    %c0_14 = arith.constant 0 : index
    %22 = vector.load %arg6[%c0_13, %c0_14] : memref<8x256xf32, #tpu.memory_space<vmem>>, vector<8x128xf32>
    tpu.vector_store %arg6[%c0_13, %c0_14], %13 {strides = array<i32>} : memref<8x256xf32, #tpu.memory_space<vmem>>, vector<8x128xf32>,
    %c0_15 = arith.constant 0 : index
    %c128 = arith.constant 128 : index
    %23 = vector.load %arg6[%c0_15, %c128] : memref<8x256xf32, #tpu.memory_space<vmem>>, vector<8x128xf32>
    tpu.vector_store %arg6[%c0_15, %c128], %21 {strides = array<i32>} : memref<8x256xf32, #tpu.memory_space<vmem>>, vector<8x128xf32>,
    return
  }
  func.func @transform_0(%arg0: i32) -> (i32, i32) {
    %c0_i32 = arith.constant 0 : i32
    %c0_i32_0 = arith.constant 0 : i32
    return %arg0, %c0_i32 : i32, i32
  }
  func.func @transform_1(%arg0: i32) -> (i32, i32) {
    %c0_i32 = arith.constant 0 : i32
    %c0_i32_0 = arith.constant 0 : i32
    %c0_i32_1 = arith.constant 0 : i32
    return %c0_i32, %c0_i32_0 : i32, i32
  }
  func.func @transform_2(%arg0: i32) -> (i32, i32) {
    %c0_i32 = arith.constant 0 : i32
    %c0_i32_0 = arith.constant 0 : i32
    %c0_i32_1 = arith.constant 0 : i32
    return %c0_i32, %c0_i32_0 : i32, i32
  }
  func.func @transform_3(%arg0: i32) -> (i32, i32) {
    %c0_i32 = arith.constant 0 : i32
    %c0_i32_0 = arith.constant 0 : i32
    %c0_i32_1 = arith.constant 0 : i32
    return %c0_i32, %c0_i32_0 : i32, i32
  }
  func.func @transform_4(%arg0: i32) -> (i32, i32) {
    %c0_i32 = arith.constant 0 : i32
    %c0_i32_0 = arith.constant 0 : i32
    %c0_i32_1 = arith.constant 0 : i32
    return %c0_i32, %c0_i32_0 : i32, i32
  }
  func.func @transform_5(%arg0: i32) -> (i32, i32) {
    %c0_i32 = arith.constant 0 : i32
    %c0_i32_0 = arith.constant 0 : i32
    return %arg0, %c0_i32 : i32, i32
  }
}

</mosaic_0001>

<bundles_post_ra>
// kernel: tpu_custom_call.1
= control target key start
LH: loop header
LB: loop body
LE: loop exit
PB: predicated region body
PF: predicated region fallthrough
CT: control target
= control target key end

     0   :  { %10 = vsyncpa [#allocation3], 0  ;;  %s470_s0 = inlined_call_operand.hbm [shape: f32[8,32], index: 0, kind: input, shape index: {}]   ;;  %s471_s1 = inlined_call_operand.hbm [shape: f32[32,128], index: 1, kind: input, shape index: {}]   ;;  %s472_s2 = inlined_call_operand.vmem [shape: f32[1,128], index: 2, kind: input, shape index: {}]   ;;  %s473_s3 = inlined_call_operand.hbm [shape: f32[128,256], index: 3, kind: input, shape index: {}]   ;;  %s474_s4 = inlined_call_operand.vmem [shape: f32[1,256], index: 4, kind: input, shape index: {}]   ;;  %s475_s5 = inlined_call_operand.hbm [shape: f32[8,256], index: 5, kind: output, shape index: {}]  }
   0x1   :  { %11 = vsyncpa [#allocation6], 0 }
   0x2   :  { %12 = vsyncpa [#allocation4], 0  ;;  %s412_s18 = smov [#allocation5]  }
   0x3   :  { %s28_s19 = sshll.u32 %s412_s18, 4  ;;  %s29_s19 = int_to_ptr.vmem [resolvable:$true] %s28_s19 }
   0x4   :  { %s334_s20 = scalar_lea.vmem %s29_s19, 512  ;;  %p339_p1 = scmp.lt.s32.totalorder %s29_s19, %s29_s19 }
   0x5   :  { %p335_p0 = scmp.ne.s32.totalorder %s29_s19, %s334_s20  ;;  %p340_p2 = scmp.lt.s32.totalorder %s334_s20, %s334_s20 }
   0x7   :  { %p341_p3 = por %p340_p2, %p339_p1 }
   0x9   :  { %p342_p4 = pnand %p341_p3, %p335_p0 }
   0xb   :  { %345 = shalt.err (!%p342_p4)
}
   0xc   :  { %s413_s21 = smov 128   ;;  %s414_s22 = smov 8  }
   0xd   :  { %34 = dma.hbm_to_vmem [thread:$0]  %s471_s1, 512, %s29_s19, [#allocation6], %s413_s21, %s413_s21, %s414_s22  }
   0xe   :  { %s415_s25 = smov [#allocation2]   ;;  %s416_s27 = smov [#allocation7]  }
   0xf   :  { %s19_s26 = sshll.u32 %s415_s25, 4  ;;  %s42_s28 = sshll.u32 %s416_s27, 4  ;;  %s20_s26 = int_to_ptr.vmem [resolvable:$true] %s19_s26  ;;  %s43_s28 = int_to_ptr.vmem [resolvable:$true] %s42_s28 }
  0x10   :  { %s354_s29 = scalar_lea.vmem %s20_s26, 128  ;;  %p359_p6 = scmp.lt.s32.totalorder %s20_s26, %s20_s26 }
  0x11   :  { %p355_p5 = scmp.ne.s32.totalorder %s20_s26, %s354_s29  ;;  %p360_p7 = scmp.lt.s32.totalorder %s354_s29, %s354_s29 }
  0x13   :  { %p361_p8 = por %p360_p7, %p359_p6 }
  0x15   :  { %p362_p9 = pnand %p361_p8, %p355_p5 }
  0x17   :  { %365 = shalt.err (!%p362_p9)
}
  0x18   :  { %22 = dma.hbm_to_vmem [thread:$0]  %s470_s0, 128, %s20_s26, [#allocation3]  }
  0x19   :  { %s374_s7 = scalar_lea.vmem %s43_s28, 4096  ;;  %p379_p11 = scmp.lt.s32.totalorder %s43_s28, %s43_s28 }
  0x1a   :  { %p375_p10 = scmp.ne.s32.totalorder %s43_s28, %s374_s7  ;;  %p380_p12 = scmp.lt.s32.totalorder %s374_s7, %s374_s7 }
  0x1c   :  { %p381_p13 = por %p380_p12, %p379_p11 }
  0x1e   :  { %p382_p0 = pnand %p381_p13, %p375_p10 }
  0x20   :  { %385 = shalt.err (!%p382_p0)
}
  0x21   :  { %s417_s1 = smov 256   ;;  %s418_s8 = smov 16  }
  0x22   :  { %48 = dma.hbm_to_vmem [thread:$0]  %s473_s3, 4096, %s43_s28, [#allocation6], %s417_s1, %s417_s1, %s418_s8  }
  0x23   :  { %406 = dma.done.wait [#allocation3], 128  }
  0x24   :  { %407 = vsyncadd [#allocation3], 4294967168 }
  0x25   :  { %408 = dma.done.wait [#allocation6], 4608  }
  0x26   :  { %409 = vsyncadd [#allocation6], 4294962688  ;;  %v419_v0 = vmov 0.0   ;;  %vm420_vm0 = vmmov 0   ;;  %v64_v1 = vld [vmem:[#allocation5 + $0x18] sm:$0xff]  ;;  %v63_v2 = vld [vmem:[#allocation5 + $0x10] sm:$0xff]  ;;  %v181_v43 = vlaneseq }
  0x27   :  { %301 = vmatprep.subr.mxu0 %v419_v0  ;;  %309 = vmatprep.mubr.msk.f32.mxu0 %vm420_vm0, %v419_v0  ;;  %v62_v3 = vld [vmem:[#allocation5 + $0x8] sm:$0xff]  ;;  %v178_v4 = vld [vmem:[#allocation7 + $0xf8] sm:$0xff]  ;;  %v177_v5 = vld [vmem:[#allocation7 + $0xf0] sm:$0xff]  ;;  %vm72_vm1 = vcmask 261120  }
  0x28   :  { %255 = vmatprep.mubr.f32.mxu1 %v419_v0  ;;  %302 = vmatpush3.msra.mxu0 %v64_v1  ;;  %v176_v6 = vld [vmem:[#allocation7 + $0xe8] sm:$0xff]  ;;  %v175_v7 = vld [vmem:[#allocation7 + $0xe0] sm:$0xff]  ;;  %v174_v8 = vld [vmem:[#allocation7 + $0xd8] sm:$0xff]  ;;  %v182_v44 = vshrl.u32 %v181_v43, 7 }
  0x29   :  { %303 = vmatprep.subr.mxu0 %v419_v0  ;;  %191 = vmatprep.subr.mxu1 %v178_v4  ;;  %v61_v9 = vld [vmem:[#allocation5] sm:$0xff]  ;;  %v173_v10 = vld [vmem:[#allocation7 + $0xd0] sm:$0xff]  ;;  %v60_v11 = vld [vmem:[#allocation2] sm:$0xff] }
  0x2a   :  { %304 = vmatpush3.msra.mxu0 %v63_v2  ;;  %192 = vmatpush1.msra.mxu1 %v177_v5  ;;  %v172_v12 = vld [vmem:[#allocation7 + $0xc8] sm:$0xff]  ;;  %v171_v13 = vld [vmem:[#allocation7 + $0xc0] sm:$0xff]  ;;  %v170_v14 = vld [vmem:[#allocation7 + $0xb8] sm:$0xff]  ;;  %v183_v45 = vsub.s32 0, %v182_v44  ;;  %v187_v47 = vsub.s32 1, %v182_v44 }
  0x2b   :  { %305 = vmatprep.subr.mxu0 %v419_v0  ;;  %193 = vmatprep.subr.mxu1 %v176_v6  ;;  %v169_v15 = vld [vmem:[#allocation7 + $0xb0] sm:$0xff]  ;;  %v168_v16 = vld [vmem:[#allocation7 + $0xa8] sm:$0xff]  ;;  %v167_v17 = vld [vmem:[#allocation7 + $0xa0] sm:$0xff] }
  0x2c   :  { %306 = vmatpush3.msra.mxu0 %v62_v3  ;;  %194 = vmatpush1.msra.mxu1 %v175_v7  ;;  %v166_v18 = vld [vmem:[#allocation7 + $0x98] sm:$0xff]  ;;  %v165_v19 = vld [vmem:[#allocation7 + $0x90] sm:$0xff]  ;;  %v164_v20 = vld [vmem:[#allocation7 + $0x88] sm:$0xff] }
  0x2d   :  { %307 = vmatprep.subr.mxu0 %v419_v0  ;;  %195 = vmatprep.subr.mxu1 %v174_v8  ;;  %v163_v21 = vld [vmem:[#allocation7 + $0x80] sm:$0xff]  ;;  %v162_v22 = vld [vmem:[#allocation7 + $0x78] sm:$0xff]  ;;  %v161_v23 = vld [vmem:[#allocation7 + $0x70] sm:$0xff] }
  0x2e   :  { %308 = vmatpush3.msra.mxu0 %v61_v9  ;;  %196 = vmatpush1.msra.mxu1 %v173_v10  ;;  %v160_v24 = vld [vmem:[#allocation7 + $0x68] sm:$0xff]  ;;  %v159_v25 = vld [vmem:[#allocation7 + $0x60] sm:$0xff]  ;;  %v158_v26 = vld [vmem:[#allocation7 + $0x58] sm:$0xff] }
  0x2f   :  { %310 = vmatmul.mubr.msk.f32.vlgmr.msra.gmra.mxu0 %vm72_vm1, %v60_v11  ;;  %197 = vmatprep.subr.mxu1 %v172_v12  ;;  %v157_v27 = vld [vmem:[#allocation7 + $0x50] sm:$0xff]  ;;  %v156_v28 = vld [vmem:[#allocation7 + $0x48] sm:$0xff]  ;;  %v155_v29 = vld [vmem:[#allocation7 + $0x40] sm:$0xff] }
  0x30   :  { %198 = vmatpush1.msra.mxu1 %v171_v13  ;;  %v154_v30 = vld [vmem:[#allocation7 + $0x38] sm:$0xff]  ;;  %v153_v31 = vld [vmem:[#allocation7 + $0x30] sm:$0xff]  ;;  %v152_v32 = vld [vmem:[#allocation7 + $0x28] sm:$0xff] }
  0x31   :  { %199 = vmatprep.subr.mxu1 %v170_v14  ;;  %v151_v33 = vld [vmem:[#allocation7 + $0x20] sm:$0xff]  ;;  %v150_v34 = vld [vmem:[#allocation7 + $0x18] sm:$0xff]  ;;  %v149_v35 = vld [vmem:[#allocation7 + $0x10] sm:$0xff] }
  0x32   :  { %200 = vmatpush1.msra.mxu1 %v169_v15  ;;  %v148_v36 = vld [vmem:[#allocation7 + $0x8] sm:$0xff]  ;;  %v147_v37 = vld [vmem:[#allocation7] sm:$0xff]  ;;  %v294_v38 = vld [vmem:[%s472_s2] ss:$0 sm:$0xff]  ;;  %s421_s2 = smov [#allocation8]  }
  0x33   :  { %201 = vmatprep.subr.mxu1 %v168_v16  ;;  %v179_v46 = vld [vmem:[%s474_s4] sm:$0x3]  ;;  %s284_s4 = sshll.u32 %s421_s2, 4  ;;  %s285_s4 = int_to_ptr.vmem [resolvable:$true] %s284_s4 }
  0x34   :  { %202 = vmatpush1.msra.mxu1 %v167_v17  ;;  %v184_v48 = vrot.slane %v179_v46, %v183_v45  ;;  %v188_v49 = vrot.slane %v179_v46, %v187_v47  ;;  %s386_s13 = scalar_lea.vmem %s285_s4, 256  ;;  %p391_p2 = scmp.lt.s32.totalorder %s285_s4, %s285_s4 }
  0x35   :  { %203 = vmatprep.subr.mxu1 %v166_v18  ;;  %p387_p1 = scmp.ne.s32.totalorder %s285_s4, %s386_s13  ;;  %p392_p3 = scmp.lt.s32.totalorder %s386_s13, %s386_s13 }
  0x36   :  { %204 = vmatpush1.msra.mxu1 %v165_v19 }
  0x37   :  { %205 = vmatprep.subr.mxu1 %v164_v20  ;;  %p393_p4 = por %p392_p3, %p391_p2 }
  0x38   :  { %206 = vmatpush1.msra.mxu1 %v163_v21 }
  0x39   :  { %207 = vmatprep.subr.mxu1 %v162_v22  ;;  %p394_p5 = pnand %p393_p4, %p387_p1 }
  0x3a   :  { %208 = vmatpush1.msra.mxu1 %v161_v23 }
  0x3b   :  { %209 = vmatprep.subr.mxu1 %v160_v24 }
  0x3c   :  { %210 = vmatpush1.msra.mxu1 %v159_v25 }
  0x3d   :  { %211 = vmatprep.subr.mxu1 %v158_v26 }
  0x3e   :  { %212 = vmatpush1.msra.mxu1 %v157_v27 }
  0x3f   :  { %213 = vmatprep.subr.mxu1 %v156_v28 }
  0x40   :  { %214 = vmatpush1.msra.mxu1 %v155_v29 }
  0x41   :  { %215 = vmatprep.subr.mxu1 %v154_v30 }
  0x42   :  { %216 = vmatpush1.msra.mxu1 %v153_v31 }
  0x43   :  { %217 = vmatprep.subr.mxu1 %v152_v32 }
  0x44   :  { %218 = vmatpush1.msra.mxu1 %v151_v33 }
  0x45   :  { %219 = vmatprep.subr.mxu1 %v150_v34 }
  0x46   :  { %220 = vmatpush1.msra.mxu1 %v149_v35 }
  0x47   :  { %221 = vmatprep.subr.mxu1 %v148_v36 }
  0x48   :  { %222 = vmatpush1.msra.mxu1 %v147_v37 }
  0xef   :  { %v142_v39 = vpop.f32.mrf.mxu0 }
  0xf0   :  { %v143_v40 = vadd.f32 %v294_v38, %v142_v39 }
  0xf1   :  { %v311_v41 = vpop.f32.mrf.mxu0 }
  0xf2   :  { %v146_v42 = vmax.f32 %v143_v40, 0.0 }
  0xf4   :  { %256 = vmatmul.mubr.f32.vlgmr.msra.gmra.mxu1 %v146_v42 }
 0x1b4   :  { %v257_v50 = vpop.f32.mrf.mxu1 }
 0x1b5   :  { %v258_v51 = vadd.f32 %v257_v50, %v184_v48 }
 0x1b6   :  { %v259_v52 = vpop.f32.mrf.mxu1 }
 0x1b7   :  { %276 = vst [vmem:[#allocation8] sm:$0xff] %v258_v51  ;;  %v260_v53 = vadd.f32 %v259_v52, %v188_v49 }
 0x1b9   :  { %v263_v54 = vmin.f32 %v260_v53, 20.0  ;;  %vm262_vm3 = vcmp.gt.f32.partialorder %v260_v53, 20.0 }
 0x1bb   :  { %v264_v55 = vmul.f32 1.442695, %v263_v54 }
 0x1bd   :  { %322 = vpow2.f32 %v264_v55 }
 0x1ca   :  { %v323_v56 = vpop.eup %322 }
 0x1cb   :  { %v266_v57 = vadd.f32 1.0, %v323_v56  ;;  %v269_v58 = vmul.f32 -0.5, %v323_v56  ;;  %v272_v60 = vand.u32 2147483647, %v323_v56 }
 0x1cd   :  { %324 = vlog2.f32 %v266_v57  ;;  %v270_v59 = vadd.f32 1.0, %v269_v58  ;;  %vm273_vm2 = vcmp.lt.f32.partialorder %v272_v60, 0.0004427343 }
 0x1cf   :  { %v271_v63 = vmul.f32 %v323_v56, %v270_v59 }
 0x1da   :  { %v325_v61 = vpop.eup %324 }
 0x1db   :  { %v268_v62 = vmul.f32 0.6931472, %v325_v61 }
 0x1dd   :  { %v274_v0 = vsel %vm273_vm2, %v271_v63, %v268_v62 }
 0x1de   :  { %v275_v1 = vsel %vm262_vm3, %v260_v53, %v274_v0 }
 0x1df   :  { %277 = vst [vmem:[#allocation8 + $0x8] sm:$0xff] %v275_v1 }
 0x1e0   :  { %397 = shalt.err (!%p394_p5)
}
 0x1e1   :  { %287 = dma.vmem_to_hbm [thread:$0]  %s285_s4, 256, %s475_s5, [#allocation4]  }
 0x1e2   :  { %410 = dma.done.wait [#allocation4], 256  }
 0x1e3   :  { %411 = vsyncadd [#allocation4], 4294967040 }
 0x1e4   :  { %291 = vsyncpa [#allocation3], 1 }
 0x1e5   :  { %292 = vsyncpa [#allocation6], 1 }
 0x1e6   :  { %293 = vsyncpa [#allocation4], 1 }

</bundles_post_ra>
